<compile_context>
chip_gen: v5e
topology: v5e:2x2
jax: 0.10.0
libtpu: 0.0.40
codegen_flags: <defaults>
</compile_context>

<pallas_src>
import jax
import jax.numpy as jnp
from jax.experimental import pallas as pl
from jax.experimental.pallas import tpu as pltpu

IGNORE_INDEX = 255


def _round_up(x, m):
    return ((x + m - 1) // m) * m


def _make_depth_loss_kernel(hw_total, tile_hw, bsn_total, rows,
                            need_col_mask, need_row_mask):
    """All args are static Python ints/bools closed over by the kernel."""

    def kernel(logits_ref, target_ref, out_ref):
        # logits_ref: (rows, d, tile_hw) native dtype
        # target_ref: (rows, tile_hw)    int32
        # out_ref:    (rows, tile_hw)    f32 lane-dense partial sums (resident over j)
        i = pl.program_id(0)
        j = pl.program_id(1)

        @pl.when(j == 0)
        def _init():
            out_ref[...] = jnp.zeros_like(out_ref)

        logits = logits_ref[...]                              # (rows, d, tile_hw)
        tgt = target_ref[...]                                 # (rows, tile_hw) int32

        # Max in the wire dtype (exact), upcast only for the shifted logits.
        m = jnp.max(logits, axis=1, keepdims=True)            # (rows, 1, tile_hw)
        shifted = logits.astype(jnp.float32) - m.astype(jnp.float32)

        # Denominator: sum_d exp(shifted)  (shifted <= 0, so exp is bounded).
        sum_exp = jnp.sum(jnp.exp(shifted), axis=1)           # (rows, tile_hw)

        # Numerator: shifted logit at the target class via one-hot select.
        d_bins = shifted.shape[1]
        cls_idx = jax.lax.broadcasted_iota(jnp.int32, (1, d_bins, 1), 1)
        onehot = cls_idx == tgt[:, None, :]                   # (rows, d, tile_hw)
        picked = jnp.sum(jnp.where(onehot, shifted, 0.0), axis=1)   # (rows, tile_hw)

        loss = jnp.log(sum_exp) - picked                      # (rows, tile_hw)

        # Masks: ignore_index always; OOB columns/rows only when shapes need it.
        valid = tgt != IGNORE_INDEX
        if need_col_mask:
            col = j * tile_hw + jax.lax.broadcasted_iota(jnp.int32, (1, tile_hw), 1)
            valid = valid & (col < hw_total)
        if need_row_mask:
            row = i * rows + jax.lax.broadcasted_iota(jnp.int32, (rows, 1), 0)
            valid = valid & (row < bsn_total)

        out_ref[...] += jnp.where(valid, loss, 0.0)

    return kernel


def depth_loss(prediction, target, *, max_tile_hw=2048):
    """prediction: (b, s, n, d, h, w) float; target: (b, s, n, h, w) int."""
    b, s, n, d, h, w = prediction.shape
    bsn = b * s * n
    hw = h * w
    total_pixels = bsn * hw

    # Free contiguous reshapes — keep native layout & dtype (no HBM transpose,
    # no wrapper-side upcast / padding copies).
    logits = prediction.reshape(bsn, d, hw)
    tgt = target.reshape(bsn, hw).astype(jnp.int32)

    # Row blocking: 8 BSN rows per grid step (full sublanes); fall back to the
    # full extent when bsn < 8.
    rows = 8 if bsn >= 8 else bsn
    n_row_tiles = pl.cdiv(bsn, rows)

    # Lane-dense tile along the pixel axis: multiple of 128, capped both by
    # max_tile_hw and by a ~2 MiB f32 intermediate budget for (rows, d, tile).
    budget_bytes = 2 * 1024 * 1024
    budget_cap = max(128, (budget_bytes // (rows * d * 4)) // 128 * 128)
    tile_hw = min(_round_up(hw, 128), _round_up(max_tile_hw, 128), budget_cap)
    n_hw_tiles = pl.cdiv(hw, tile_hw)

    need_col_mask = (hw % tile_hw) != 0
    need_row_mask = (bsn % rows) != 0

    kernel = _make_depth_loss_kernel(hw, tile_hw, bsn, rows,
                                     need_col_mask, need_row_mask)

    # VMEM budget: double-buffered blocks + slack; >= defaults, <= v7x physical.
    itemsize = jnp.dtype(prediction.dtype).itemsize
    block_bytes = 2 * (rows * d * tile_hw * itemsize      # logits (in)
                       + rows * tile_hw * 4               # target (in)
                       + rows * tile_hw * 4)              # output
    vmem_limit = int(min(64 * 2**20, max(32 * 2**20, 2 * block_bytes)))

    # Output padded to a whole number of row blocks (OOB rows are zeroed by
    # the in-kernel row mask, so summing the whole thing is safe).
    out_rows = n_row_tiles * rows

    partial = pl.pallas_call(
        kernel,
        out_shape=jax.ShapeDtypeStruct((out_rows, tile_hw), jnp.float32),
        grid_spec=pltpu.PrefetchScalarGridSpec(
            num_scalar_prefetch=0,
            grid=(n_row_tiles, n_hw_tiles),
            in_specs=[
                pl.BlockSpec((rows, d, tile_hw), lambda i, j: (i, 0, j)),
                pl.BlockSpec((rows, tile_hw), lambda i, j: (i, j)),
            ],
            out_specs=pl.BlockSpec((rows, tile_hw), lambda i, j: (i, 0)),
        ),
        compiler_params=pltpu.CompilerParams(
            dimension_semantics=("parallel", "arbitrary"),
            vmem_limit_bytes=vmem_limit,
        ),
    )(logits, tgt)

    # Mean over ALL pixels (ignored pixels contribute 0 but are still counted).
    return (jnp.sum(partial) / jnp.float32(total_pixels)).astype(jnp.float32)


def _reference(prediction, target):
    b, s, n, d, h, w = prediction.shape
    logits = jnp.moveaxis(
        prediction.reshape(b * s * n, d, h * w), 1, 2).astype(jnp.float32)  # (BSN, HW, d)
    tgt = target.reshape(b * s * n, h * w).astype(jnp.int32)
    logp = jax.nn.log_softmax(logits, axis=-1)
    safe_tgt = jnp.where(tgt == IGNORE_INDEX, 0, tgt)
    nll = -jnp.take_along_axis(logp, safe_tgt[..., None], axis=-1)[..., 0]
    nll = jnp.where(tgt == IGNORE_INDEX, 0.0, nll)
    return jnp.mean(nll)


def _run_case(key, shape, **kwargs):
    b, s, n, d, h, w = shape
    k1, k2, k3 = jax.random.split(key, 3)
    prediction = jax.random.normal(k1, (b, s, n, d, h, w), dtype=jnp.float32)
    target = jax.random.randint(k2, (b, s, n, h, w), 0, d, dtype=jnp.int32)
    ignore_mask = jax.random.uniform(k3, (b, s, n, h, w)) < 0.1
    target = jnp.where(ignore_mask, IGNORE_INDEX, target)

    out = depth_loss(prediction, target, **kwargs)
    jax.block_until_ready(out)
    ref = _reference(prediction, target)
    assert jnp.allclose(out, ref, rtol=1e-5, atol=1e-5), (shape, out, ref)


if __name__ == "__main__":
    key = jax.random.PRNGKey(0)
    k_a, k_b = jax.random.split(key)

    # Case 1: divisible everywhere (bsn=8, hw=128) — fast path, no masks.
    _run_case(k_a, (2, 2, 2, 16, 8, 16))

    # Case 2: ragged bsn (=10) and ragged hw tiles (384 px, 256-lane tiles)
    # — exercises the row- and column-mask paths.
    _run_case(k_b, (1, 5, 2, 12, 8, 48), max_tile_hw=256)

    print("KERNEL_OK")
</pallas_src>

<mosaic_0001>
module attributes {stable_mosaic.version = 11 : i64} {
  func.func @kernel(%arg0: i32, %arg1: i32, %arg2: memref<8x16x128xf32, #tpu.memory_space<vmem>>, %arg3: memref<8x128xi32, #tpu.memory_space<vmem>>, %arg4: memref<8x128xf32, #tpu.memory_space<vmem>>) attributes {dimension_semantics = [#tpu.dimension_semantics<parallel>, #tpu.dimension_semantics<arbitrary>], iteration_bounds = array<i64: 1, 1>, scalar_prefetch = 0 : i64, scratch_operands = 0 : i64, tpu.core_type = #tpu.core_type<tc>, window_params = [{transform_indices = @transform_0, window_bounds = array<i64: 8, 16, 128>}, {transform_indices = @transform_1, window_bounds = array<i64: 8, 128>}, {transform_indices = @transform_2, window_bounds = array<i64: 8, 128>}]} {
    %c0_i32 = arith.constant 0 : i32
    %0 = arith.cmpi eq, %arg1, %c0_i32 : i32
    %1 = arith.extui %0 : i1 to i32
    %c0_i32_0 = arith.constant 0 : i32
    %2 = arith.cmpi ne, %1, %c0_i32_0 : i32
    scf.if %2 {
      %cst_13 = arith.constant 0.000000e+00 : f32
      %28 = vector.broadcast %cst_13 : f32 to vector<8x128xf32>
      %c0_14 = arith.constant 0 : index
      %c0_15 = arith.constant 0 : index
      %29 = vector.load %arg4[%c0_14, %c0_15] : memref<8x128xf32, #tpu.memory_space<vmem>>, vector<8x128xf32>
      tpu.vector_store %arg4[%c0_14, %c0_15], %28 {strides = array<i32>} : memref<8x128xf32, #tpu.memory_space<vmem>>, vector<8x128xf32>,
    } else {
    }
    %c0 = arith.constant 0 : index
    %c0_1 = arith.constant 0 : index
    %c0_2 = arith.constant 0 : index
    %3 = vector.load %arg2[%c0, %c0_1, %c0_2] : memref<8x16x128xf32, #tpu.memory_space<vmem>>, vector<8x16x128xf32>
    %c0_3 = arith.constant 0 : index
    %c0_4 = arith.constant 0 : index
    %4 = vector.load %arg3[%c0_3, %c0_4] : memref<8x128xi32, #tpu.memory_space<vmem>>, vector<8x128xi32>
    %cst = arith.constant dense<0xFF800000> : vector<8x128xf32>
    %5 = vector.multi_reduction <maximumf>, %3, %cst [1] : vector<8x16x128xf32> to vector<8x128xf32>
    %6 = vector.shape_cast %5 : vector<8x128xf32> to vector<8x1x128xf32>
    %7 = vector.broadcast %6 : vector<8x1x128xf32> to vector<8x16x128xf32>
    %8 = arith.subf %3, %7 : vector<8x16x128xf32>
    %9 = math.exp %8 : vector<8x16x128xf32>
    %cst_5 = arith.constant dense<0.000000e+00> : vector<8x128xf32>
    %10 = vector.multi_reduction <add>, %9, %cst_5 [1] : vector<8x16x128xf32> to vector<8x128xf32>
    %11 = tpu.iota {dimensions = array<i32: 1>} : vector<1x16x1xi32>
    %12 = vector.shape_cast %4 : vector<8x128xi32> to vector<8x1x128xi32>
    %13 = vector.broadcast %11 : vector<1x16x1xi32> to vector<8x16x128xi32>
    %14 = vector.broadcast %12 : vector<8x1x128xi32> to vector<8x16x128xi32>
    %15 = arith.cmpi eq, %13, %14 : vector<8x16x128xi32>
    %cst_6 = arith.constant 0.000000e+00 : f32
    %16 = vector.broadcast %cst_6 : f32 to vector<8x16x128xf32>
    %17 = arith.select %15, %8, %16 : vector<8x16x128xi1>, vector<8x16x128xf32>
    %cst_7 = arith.constant dense<0.000000e+00> : vector<8x128xf32>
    %18 = vector.multi_reduction <add>, %17, %cst_7 [1] : vector<8x16x128xf32> to vector<8x128xf32>
    %19 = math.log %10 : vector<8x128xf32>
    %20 = arith.subf %19, %18 : vector<8x128xf32>
    %c255_i32 = arith.constant 255 : i32
    %21 = vector.broadcast %c255_i32 : i32 to vector<8x128xi32>
    %22 = arith.cmpi ne, %4, %21 : vector<8x128xi32>
    %c0_8 = arith.constant 0 : index
    %c0_9 = arith.constant 0 : index
    %23 = vector.load %arg4[%c0_8, %c0_9] : memref<8x128xf32, #tpu.memory_space<vmem>>, vector<8x128xf32>
    %cst_10 = arith.constant 0.000000e+00 : f32
    %24 = vector.broadcast %cst_10 : f32 to vector<8x128xf32>
    %25 = arith.select %22, %20, %24 : vector<8x128xi1>, vector<8x128xf32>
    %26 = arith.addf %23, %25 : vector<8x128xf32>
    %c0_11 = arith.constant 0 : index
    %c0_12 = arith.constant 0 : index
    %27 = vector.load %arg4[%c0_11, %c0_12] : memref<8x128xf32, #tpu.memory_space<vmem>>, vector<8x128xf32>
    tpu.vector_store %arg4[%c0_11, %c0_12], %26 {strides = array<i32>} : memref<8x128xf32, #tpu.memory_space<vmem>>, vector<8x128xf32>,
    return
  }
  func.func @transform_0(%arg0: i32, %arg1: i32) -> (i32, i32, i32) {
    %c0_i32 = arith.constant 0 : i32
    %c0_i32_0 = arith.constant 0 : i32
    return %arg0, %c0_i32, %arg1 : i32, i32, i32
  }
  func.func @transform_1(%arg0: i32, %arg1: i32) -> (i32, i32) {
    %c0_i32 = arith.constant 0 : i32
    return %arg0, %arg1 : i32, i32
  }
  func.func @transform_2(%arg0: i32, %arg1: i32) -> (i32, i32) {
    %c0_i32 = arith.constant 0 : i32
    %c0_i32_0 = arith.constant 0 : i32
    return %arg0, %c0_i32 : i32, i32
  }
}

</mosaic_0001>

<bundles_post_ra>
// kernel: tpu_custom_call.1
= control target key start
LH: loop header
LB: loop body
LE: loop exit
PB: predicated region body
PF: predicated region fallthrough
CT: control target
= control target key end

     0   :  { %7 = vsyncpa [#allocation3], 0  ;;  %s781_s0 = inlined_call_operand.hbm [shape: f32[8,16,128], index: 0, kind: input, shape index: {}]   ;;  %s782_s1 = inlined_call_operand.hbm [shape: s32[8,128], index: 1, kind: input, shape index: {}]   ;;  %s783_s2 = inlined_call_operand.hbm [shape: f32[8,128], index: 2, kind: output, shape index: {}]  }
   0x1   :  { %8 = vsyncpa [#allocation6], 0 }
   0x2   :  { %9 = vsyncpa [#allocation4], 0  ;;  %s14_s11 = sshll.u32 %s781_s0, 4  ;;  %s532_s12 = smov [#allocation2]   ;;  %s15_s11 = int_to_ptr.hbm [resolvable:$true] %s14_s11 }
   0x3   :  { %s16_s13 = sshll.u32 %s532_s12, 4  ;;  %s28_s16 = sshll.u32 %s782_s1, 4  ;;  %s17_s13 = int_to_ptr.vmem [resolvable:$true] %s16_s13  ;;  %s29_s16 = int_to_ptr.hbm [resolvable:$true] %s28_s16 }
   0x4   :  { %s533_s17 = smov 128   ;;  %s534_s18 = smov 8  }
   0x5   :  { %22 = dma.hbm_to_vmem [thread:$0]  %s15_s11, 2048, %s17_s13, [#allocation3], %s533_s17, %s533_s17, %s534_s18  }
   0x6   :  { %s535_s19 = smov [#allocation5]  }
   0x7   :  { %s30_s20 = sshll.u32 %s535_s19, 4  ;;  %s31_s20 = int_to_ptr.vmem [resolvable:$true] %s30_s20 }
   0x8   :  { %33 = dma.hbm_to_vmem [thread:$0]  %s29_s16, 128, %s31_s20, [#allocation6]  }
   0x9   :  { %526 = dma.done.wait [#allocation3], 2048  }
   0xa   :  { %527 = vsyncadd [#allocation3], 4294965248 }
   0xb   :  { %528 = dma.done.wait [#allocation6], 128  }
   0xc   :  { %529 = vsyncadd [#allocation6], 4294967168  ;;  %v558_v0 = vld [vmem:[#allocation2] sm:$0xff]  ;;  %v560_v1 = vld [vmem:[#allocation2 + $0x8] sm:$0xff]  ;;  %s536_s0 = smov [#allocation7]   ;;  %s389_s23 = sshll.u32 %s783_s2, 4  ;;  %s390_s23 = int_to_ptr.hbm [resolvable:$true] %s389_s23 }
   0xd   :  { %v562_v2 = vld [vmem:[#allocation2 + $0x10] sm:$0xff]  ;;  %v564_v3 = vld [vmem:[#allocation2 + $0x18] sm:$0xff]  ;;  %v566_v4 = vld [vmem:[#allocation2 + $0x20] sm:$0xff]  ;;  %v64_v6 = vmax.f32 %v558_v0, %v560_v1  ;;  %s387_s1 = sshll.u32 %s536_s0, 4  ;;  %s388_s1 = int_to_ptr.vmem [resolvable:$true] %s387_s1 }
   0xe   :  { %v568_v5 = vld [vmem:[#allocation2 + $0x28] sm:$0xff]  ;;  %v572_v7 = vld [vmem:[#allocation2 + $0x30] sm:$0xff]  ;;  %v574_v8 = vld [vmem:[#allocation2 + $0x38] sm:$0xff]  ;;  %v71_v10 = vmax.f32 %v562_v2, %v564_v3 }
   0xf   :  { %v576_v9 = vld [vmem:[#allocation2 + $0x40] sm:$0xff]  ;;  %v78_v11 = vmax.f32 %v566_v4, %v568_v5  ;;  %v582_v12 = vld [vmem:[#allocation2 + $0x48] sm:$0xff]  ;;  %v584_v13 = vld [vmem:[#allocation2 + $0x50] sm:$0xff]  ;;  %v65_v15 = vrot.slane %v64_v6, 4  ;;  %v85_v16 = vmax.f32 %v572_v7, %v574_v8 }
  0x10   :  { %v586_v14 = vld [vmem:[#allocation2 + $0x58] sm:$0xff]  ;;  %v590_v17 = vld [vmem:[#allocation2 + $0x60] sm:$0xff]  ;;  %v592_v18 = vld [vmem:[#allocation2 + $0x68] sm:$0xff]  ;;  %v72_v20 = vrot.slane %v71_v10, 4  ;;  %v92_v22 = vmax.f32 %v576_v9, %v582_v12 }
  0x11   :  { %v594_v19 = vld [vmem:[#allocation2 + $0x70] sm:$0xff]  ;;  %v79_v21 = vrot.slane %v78_v11, 4  ;;  %v99_v23 = vmax.f32 %v584_v13, %v586_v14  ;;  %v600_v24 = vld [vmem:[#allocation2 + $0x78] sm:$0xff]  ;;  %v66_v25 = vmax.f32 %v64_v6, %v65_v15  ;;  %v86_v26 = vrot.slane %v85_v16, 4 }
  0x12   :  { %v106_v27 = vmax.f32 %v590_v17, %v592_v18  ;;  %v73_v28 = vmax.f32 %v71_v10, %v72_v20  ;;  %v93_v30 = vrot.slane %v92_v22, 4  ;;  %v113_v35 = vmax.f32 %v594_v19, %v600_v24 }
  0x13   :  { %v80_v29 = vmax.f32 %v78_v11, %v79_v21  ;;  %v100_v31 = vrot.slane %v99_v23, 4  ;;  %v67_v32 = vrot.slane %v66_v25, 2  ;;  %v87_v33 = vmax.f32 %v85_v16, %v86_v26 }
  0x14   :  { %v107_v34 = vrot.slane %v106_v27, 4  ;;  %v74_v36 = vrot.slane %v73_v28, 2  ;;  %v94_v38 = vmax.f32 %v92_v22, %v93_v30  ;;  %v114_v43 = vrot.slane %v113_v35, 4 }
  0x15   :  { %v81_v37 = vrot.slane %v80_v29, 2  ;;  %v101_v39 = vmax.f32 %v99_v23, %v100_v31  ;;  %v68_v40 = vmax.f32 %v66_v25, %v67_v32  ;;  %v88_v41 = vrot.slane %v87_v33, 2 }
  0x16   :  { %v108_v42 = vmax.f32 %v106_v27, %v107_v34  ;;  %v75_v44 = vmax.f32 %v73_v28, %v74_v36  ;;  %v95_v46 = vrot.slane %v94_v38, 2  ;;  %v115_v51 = vmax.f32 %v113_v35, %v114_v43  ;;  %v667_v43 = vld [vmem:[#allocation5] sm:$0xff] }
  0x17   :  { %v82_v45 = vmax.f32 %v80_v29, %v81_v37  ;;  %v102_v47 = vrot.slane %v101_v39, 2  ;;  %v69_v48 = vrot.slane %v68_v40, 1  ;;  %v89_v49 = vmax.f32 %v87_v33, %v88_v41 }
  0x18   :  { %v109_v50 = vrot.slane %v108_v42, 2  ;;  %v76_v52 = vrot.slane %v75_v44, 1  ;;  %v96_v54 = vmax.f32 %v94_v38, %v95_v46  ;;  %v116_v58 = vrot.slane %v115_v51, 2 }
  0x19   :  { %v83_v53 = vrot.slane %v82_v45, 1  ;;  %v103_v55 = vmax.f32 %v101_v39, %v102_v47  ;;  %v70_v56 = vmax.f32 %v68_v40, %v69_v48  ;;  %v90_v57 = vrot.slane %v89_v49, 1 }
  0x1a   :  { %v77_v59 = vmax.f32 %v75_v44, %v76_v52  ;;  %v97_v61 = vrot.slane %v96_v54, 1  ;;  %v110_v62 = vmax.f32 %v108_v42, %v109_v50  ;;  %v117_v10 = vmax.f32 %v115_v51, %v116_v58 }
  0x1b   :  { %v84_v60 = vmax.f32 %v82_v45, %v83_v53  ;;  %v104_v63 = vrot.slane %v103_v55, 1  ;;  %v91_v6 = vmax.f32 %v89_v49, %v90_v57  ;;  %v607_v11 = vsub.f32 %v558_v0, %v70_v56 }
  0x1c   :  { %v610_v15 = vsub.f32 %v560_v1, %v70_v56  ;;  %v613_v16 = vsub.f32 %v562_v2, %v77_v59  ;;  %v616_v20 = vsub.f32 %v564_v3, %v77_v59  ;;  %v98_v21 = vmax.f32 %v96_v54, %v97_v61 }
  0x1d   :  { %v111_v22 = vrot.slane %v110_v62, 1  ;;  %v619_v23 = vsub.f32 %v566_v4, %v84_v60  ;;  %v105_v25 = vmax.f32 %v103_v55, %v104_v63  ;;  %v622_v26 = vsub.f32 %v568_v5, %v84_v60 }
  0x1e   :  { %v118_v0 = vrot.slane %v117_v10, 1  ;;  %v625_v27 = vsub.f32 %v572_v7, %v91_v6  ;;  %v136_v1 = vmul.f32 1.442695, %v607_v11  ;;  %v138_v2 = vmul.f32 1.442695, %v610_v15 }
  0x1f   :  { %v630_v3 = vsub.f32 %v574_v8, %v91_v6  ;;  %v140_v28 = vmul.f32 1.442695, %v613_v16  ;;  %v142_v4 = vmul.f32 1.442695, %v616_v20  ;;  %v112_v29 = vmax.f32 %v110_v62, %v111_v22 }
  0x20   :  { %v635_v30 = vsub.f32 %v576_v9, %v98_v21  ;;  %406 = vpow2.f32 %v136_v1  ;;  %v144_v5 = vmul.f32 1.442695, %v619_v23  ;;  %v639_v7 = vsub.f32 %v582_v12, %v98_v21 }
  0x21   :  { %408 = vpow2.f32 %v138_v2  ;;  %v146_v31 = vmul.f32 1.442695, %v622_v26  ;;  %v119_v32 = vmax.f32 %v117_v10, %v118_v0  ;;  %v643_v8 = vsub.f32 %v584_v13, %v105_v25 }
  0x22   :  { %410 = vpow2.f32 %v140_v28  ;;  %v148_v33 = vmul.f32 1.442695, %v625_v27  ;;  %v647_v34 = vsub.f32 %v586_v14, %v105_v25  ;;  %v150_v9 = vmul.f32 1.442695, %v630_v3 }
  0x23   :  { %412 = vpow2.f32 %v142_v4  ;;  %v651_v35 = vsub.f32 %v590_v17, %v112_v29  ;;  %v152_v12 = vmul.f32 1.442695, %v635_v30  ;;  %v655_v36 = vsub.f32 %v592_v18, %v112_v29 }
  0x24   :  { %414 = vpow2.f32 %v144_v5  ;;  %v154_v13 = vmul.f32 1.442695, %v639_v7  ;;  %v659_v38 = vsub.f32 %v594_v19, %v119_v32  ;;  %v156_v14 = vmul.f32 1.442695, %v643_v8 }
  0x25   :  { %416 = vpow2.f32 %v146_v31  ;;  %v663_v17 = vsub.f32 %v600_v24, %v119_v32  ;;  %v158_v40 = vmul.f32 1.442695, %v647_v34  ;;  %v160_v18 = vmul.f32 1.442695, %v651_v35 }
  0x26   :  { %v407_v37 = vpop.eup %406  ;;  %418 = vpow2.f32 %v148_v33  ;;  %v162_v19 = vmul.f32 1.442695, %v655_v36  ;;  %v224_v45 = vlaneseq  ;;  %v164_v24 = vmul.f32 1.442695, %v659_v38 }
  0x27   :  { %v409_v39 = vpop.eup %408  ;;  %420 = vpow2.f32 %v150_v9  ;;  %v166_v49 = vmul.f32 1.442695, %v663_v17  ;;  %v227_v52 = vrot.slane %v667_v43, 1  ;;  %v228_v56 = vrot.slane %v667_v43, 2 }
  0x28   :  { %v411_v41 = vpop.eup %410  ;;  %422 = vpow2.f32 %v152_v12  ;;  %v168_v44 = vadd.f32 %v409_v39, %v407_v37  ;;  %v673_v55 = vshrl.u32 %v224_v45, 7  ;;  %v229_v60 = vrot.slane %v667_v43, 3 }
  0x29   :  { %v413_v42 = vpop.eup %412  ;;  %424 = vpow2.f32 %v154_v13  ;;  %v230_v63 = vrot.slane %v667_v43, 4  ;;  %v231_v6 = vrot.slane %v667_v43, 5  ;;  %v232_v22 = vrot.slane %v667_v43, 6 }
  0x2a   :  { %v415_v46 = vpop.eup %414  ;;  %426 = vpow2.f32 %v156_v14  ;;  %v175_v47 = vadd.f32 %v413_v42, %v411_v41  ;;  %v169_v54 = vrot.slane %v168_v44, 4  ;;  %v233_v25 = vrot.slane %v667_v43, 7 }
  0x2b   :  { %v417_v48 = vpop.eup %416  ;;  %428 = vpow2.f32 %v158_v40  ;;  %v234_v0 = vperm.slane %v667_v43, 0  ;;  %v683_v28 = vadd.s32 8, %v673_v55  ;;  %v235_v4 = vperm.slane %v227_v52, 0 }
  0x2c   :  { %v419_v50 = vpop.eup %418  ;;  %430 = vpow2.f32 %v160_v18  ;;  %v182_v51 = vadd.f32 %v417_v48, %v415_v46  ;;  %v176_v58 = vrot.slane %v175_v47, 4  ;;  %v170_v2 = vadd.f32 %v169_v54, %v168_v44 }
  0x2d   :  { %v421_v53 = vpop.eup %420  ;;  %432 = vpow2.f32 %v162_v19  ;;  %v236_v32 = vperm.slane %v228_v56, 0  ;;  %v237_v33 = vperm.slane %v229_v60, 0  ;;  %v238_v14 = vperm.slane %v230_v63, 0 }
  0x2e   :  { %v423_v57 = vpop.eup %422  ;;  %434 = vpow2.f32 %v164_v24  ;;  %v183_v59 = vrot.slane %v182_v51, 4  ;;  %v189_v62 = vadd.f32 %v421_v53, %v419_v50  ;;  %v177_v5 = vadd.f32 %v176_v58, %v175_v47 }
  0x2f   :  { %v425_v61 = vpop.eup %424  ;;  %436 = vpow2.f32 %v166_v49  ;;  %v239_v40 = vperm.slane %v231_v6, 0  ;;  %v240_v41 = vperm.slane %v232_v22, 0  ;;  %v241_v18 = vperm.slane %v233_v25, 0 }
  0x30   :  { %v427_v10 = vpop.eup %426  ;;  %v196_v21 = vadd.f32 %v425_v61, %v423_v57  ;;  %v184_v31 = vadd.f32 %v183_v59, %v182_v51  ;;  %v190_v12 = vrot.slane %v189_v62, 4  ;;  %vm686_vm0 = vcmp.eq.s32.totalorder %v673_v55, %v234_v0 }
  0x31   :  { %v429_v1 = vpop.eup %428  ;;  %v171_v44 = vrot.slane %v170_v2, 2  ;;  %vm691_vm1 = vcmp.eq.s32.totalorder %v683_v28, %v234_v0  ;;  %vm244_vm2 = vcmp.eq.s32.totalorder %v673_v55, %v235_v4  ;;  %v178_v24 = vrot.slane %v177_v5, 2 }
  0x32   :  { %v431_v29 = vpop.eup %430  ;;  %v197_v13 = vrot.slane %v196_v21, 4  ;;  %v203_v37 = vadd.f32 %v429_v1, %v427_v10  ;;  %v185_v47 = vrot.slane %v184_v31, 2  ;;  %vm245_vm3 = vcmp.eq.s32.totalorder %v683_v28, %v235_v4 }
  0x33   :  { %v433_v9 = vpop.eup %432  ;;  %vm246_vm4 = vcmp.eq.s32.totalorder %v673_v55, %v236_v32  ;;  %v191_v48 = vadd.f32 %v190_v12, %v189_v62  ;;  %vm247_vm5 = vcmp.eq.s32.totalorder %v683_v28, %v236_v32  ;;  %vm248_vm6 = vcmp.eq.s32.totalorder %v673_v55, %v237_v33 }
  0x34   :  { %v435_v39 = vpop.eup %434  ;;  %v204_v45 = vrot.slane %v203_v37, 4  ;;  %v698_v49 = vadd.f32 %v197_v13, %v196_v21  ;;  %v210_v50 = vadd.f32 %v433_v9, %v431_v29  ;;  %vm249_vm7 = vcmp.eq.s32.totalorder %v683_v28, %v237_v33 }
  0x35   :  { %v437_v19 = vpop.eup %436  ;;  %v705_v53 = vadd.f32 %v171_v44, %v170_v2  ;;  %vm250_vm8 = vcmp.eq.s32.totalorder %v673_v55, %v238_v14  ;;  %vm251_vm9 = vcmp.eq.s32.totalorder %v683_v28, %v238_v14  ;;  %vm252_vm10 = vcmp.eq.s32.totalorder %v673_v55, %v239_v40 }
  0x36   :  { %v701_v51 = vadd.f32 %v204_v45, %v203_v37  ;;  %v217_v52 = vadd.f32 %v437_v19, %v435_v39  ;;  %v710_v54 = vadd.f32 %v178_v24, %v177_v5  ;;  %v712_v56 = vadd.f32 %v185_v47, %v184_v31 }
  0x37   :  { %vm253_vm11 = vcmp.eq.s32.totalorder %v683_v28, %v239_v40  ;;  %vm254_vm12 = vcmp.eq.s32.totalorder %v673_v55, %v240_v41  ;;  %v192_v57 = vrot.slane %v191_v48, 2  ;;  %v199_v58 = vrot.slane %v698_v49, 2 }
  0x38   :  { %v211_v59 = vrot.slane %v210_v50, 4  ;;  %vm255_vm13 = vcmp.eq.s32.totalorder %v683_v28, %v240_v41  ;;  %v206_v60 = vrot.slane %v701_v51, 2  ;;  %v218_v61 = vrot.slane %v217_v52, 4 }
  0x39   :  { %vm256_vm14 = vcmp.eq.s32.totalorder %v673_v55, %v241_v18  ;;  %vm257_vm15 = vcmp.eq.s32.totalorder %v683_v28, %v241_v18  ;;  %v258_v62 = vsel %vm686_vm0, %v607_v11, 0.0  ;;  %v259_v63 = vsel %vm691_vm1, %v610_v15, 0.0 }
  0x3a   :  { %v260_v6 = vsel %vm244_vm2, %v613_v16, 0.0  ;;  %v261_v10 = vsel %vm245_vm3, %v616_v20, 0.0  ;;  %v262_v21 = vsel %vm246_vm4, %v619_v23, 0.0  ;;  %v263_v11 = vsel %vm247_vm5, %v622_v26, 0.0 }
  0x3b   :  { %v264_v15 = vsel %vm248_vm6, %v625_v27, 0.0  ;;  %v265_v16 = vsel %vm249_vm7, %v630_v3, 0.0  ;;  %v266_v20 = vsel %vm250_vm8, %v635_v30, 0.0  ;;  %v267_v23 = vsel %vm251_vm9, %v639_v7, 0.0 }
  0x3c   :  { %v268_v26 = vsel %vm252_vm10, %v643_v8, 0.0  ;;  %v269_v27 = vsel %vm253_vm11, %v647_v34, 0.0  ;;  %v212_v22 = vadd.f32 %v211_v59, %v210_v50  ;;  %v270_v3 = vsel %vm254_vm12, %v651_v35, 0.0 }
  0x3d   :  { %v271_v30 = vsel %vm255_vm13, %v655_v36, 0.0  ;;  %v272_v7 = vsel %vm256_vm14, %v659_v38, 0.0  ;;  %v273_v8 = vsel %vm257_vm15, %v663_v17, 0.0  ;;  %v274_v25 = vadd.f32 %v259_v63, %v258_v62 }
  0x3e   :  { %v281_v0 = vadd.f32 %v261_v10, %v260_v6  ;;  %v288_v34 = vadd.f32 %v263_v11, %v262_v21  ;;  %v219_v1 = vadd.f32 %v218_v61, %v217_v52  ;;  %v295_v2 = vadd.f32 %v265_v16, %v264_v15 }
  0x3f   :  { %v302_v4 = vadd.f32 %v267_v23, %v266_v20  ;;  %v309_v29 = vadd.f32 %v269_v27, %v268_v26  ;;  %v275_v35 = vrot.slane %v274_v25, 4  ;;  %v316_v32 = vadd.f32 %v271_v30, %v270_v3 }
  0x40   :  { %v282_v5 = vrot.slane %v281_v0, 4  ;;  %v289_v31 = vrot.slane %v288_v34, 4  ;;  %v296_v36 = vrot.slane %v295_v2, 4  ;;  %v323_v55 = vadd.f32 %v273_v8, %v272_v7 }
  0x41   :  { %v303_v33 = vrot.slane %v302_v4, 4  ;;  %v310_v9 = vrot.slane %v309_v29, 4  ;;  %v213_v38 = vrot.slane %v212_v22, 2  ;;  %v276_v12 = vadd.f32 %v275_v35, %v274_v25 }
  0x42   :  { %v283_v13 = vadd.f32 %v282_v5, %v281_v0  ;;  %v317_v28 = vrot.slane %v316_v32, 4  ;;  %v193_v17 = vadd.f32 %v192_v57, %v191_v48  ;;  %v220_v37 = vrot.slane %v219_v1, 2 }
  0x43   :  { %v290_v14 = vadd.f32 %v289_v31, %v288_v34  ;;  %v324_v39 = vrot.slane %v323_v55, 4  ;;  %v173_v40 = vrot.slane %v705_v53, 1  ;;  %v200_v41 = vadd.f32 %v199_v58, %v698_v49 }
  0x44   :  { %v297_v18 = vadd.f32 %v296_v36, %v295_v2  ;;  %v304_v42 = vadd.f32 %v303_v33, %v302_v4  ;;  %v180_v19 = vrot.slane %v710_v54, 1  ;;  %v207_v44 = vadd.f32 %v206_v60, %v701_v51 }
  0x45   :  { %v277_v45 = vrot.slane %v276_v12, 2  ;;  %v311_v46 = vadd.f32 %v310_v9, %v309_v29  ;;  %v187_v24 = vrot.slane %v712_v56, 1  ;;  %v214_v47 = vadd.f32 %v213_v38, %v212_v22 }
  0x46   :  { %v284_v50 = vrot.slane %v283_v13, 2  ;;  %v318_v48 = vadd.f32 %v317_v28, %v316_v32  ;;  %v194_v52 = vrot.slane %v193_v17, 1  ;;  %v221_v57 = vadd.f32 %v220_v37, %v219_v1 }
  0x47   :  { %v291_v59 = vrot.slane %v290_v14, 2  ;;  %v325_v61 = vadd.f32 %v324_v39, %v323_v55  ;;  %v174_v62 = vadd.f32 %v173_v40, %v705_v53  ;;  %v201_v49 = vrot.slane %v200_v41, 1 }
  0x48   :  { %v298_v58 = vrot.slane %v297_v18, 2  ;;  %v305_v63 = vrot.slane %v304_v42, 2  ;;  %v181_v6 = vadd.f32 %v180_v19, %v710_v54  ;;  %v208_v10 = vrot.slane %v207_v44, 1 }
  0x49   :  { %v278_v51 = vadd.f32 %v277_v45, %v276_v12  ;;  %v312_v60 = vrot.slane %v311_v46, 2  ;;  %v188_v21 = vadd.f32 %v187_v24, %v712_v56  ;;  %v215_v11 = vrot.slane %v214_v47, 1 }
  0x4a   :  { %v285_v15 = vadd.f32 %v284_v50, %v283_v13  ;;  %v319_v16 = vrot.slane %v318_v48, 2  ;;  %v195_v20 = vadd.f32 %v194_v52, %v193_v17  ;;  %v222_v23 = vrot.slane %v221_v57, 1 }
  0x4b   :  { %v292_v26 = vadd.f32 %v291_v59, %v290_v14  ;;  %v326_v27 = vrot.slane %v325_v61, 2  ;;  %v202_v22 = vadd.f32 %v201_v49, %v200_v41  ;;  %v299_v3 = vadd.f32 %v298_v58, %v297_v18 }
  0x4c   :  { %v306_v53 = vadd.f32 %v305_v63, %v304_v42  ;;  %438 = vlog2.f32 %v174_v62  ;;  %v209_v30 = vadd.f32 %v208_v10, %v207_v44  ;;  %v279_v7 = vrot.slane %v278_v51, 1 }
  0x4d   :  { %v313_v8 = vadd.f32 %v312_v60, %v311_v46  ;;  %440 = vlog2.f32 %v181_v6  ;;  %v216_v54 = vadd.f32 %v215_v11, %v214_v47  ;;  %v286_v25 = vrot.slane %v285_v15, 1 }
  0x4e   :  { %v320_v0 = vadd.f32 %v319_v16, %v318_v48  ;;  %442 = vlog2.f32 %v188_v21  ;;  %v223_v56 = vadd.f32 %v222_v23, %v221_v57  ;;  %v293_v34 = vrot.slane %v292_v26, 1 }
  0x4f   :  { %v327_v1 = vadd.f32 %v326_v27, %v325_v61  ;;  %444 = vlog2.f32 %v195_v20  ;;  %v300_v2 = vrot.slane %v299_v3, 1  ;;  %v307_v4 = vrot.slane %v306_v53, 1 }
  0x50   :  { %446 = vlog2.f32 %v202_v22  ;;  %v280_v29 = vadd.f32 %v279_v7, %v278_v51  ;;  %v314_v35 = vrot.slane %v313_v8, 1  ;;  %v287_v31 = vadd.f32 %v286_v25, %v285_v15 }
  0x51   :  { %448 = vlog2.f32 %v209_v30  ;;  %v321_v32 = vrot.slane %v320_v0, 1  ;;  %v294_v33 = vadd.f32 %v293_v34, %v292_v26  ;;  %v328_v9 = vrot.slane %v327_v1, 1 }
  0x52   :  { %v439_v5 = vpop.eup %438  ;;  %450 = vlog2.f32 %v216_v54  ;;  %v301_v12 = vadd.f32 %v300_v2, %v299_v3  ;;  %v308_v13 = vadd.f32 %v307_v4, %v306_v53  ;;  %v315_v37 = vadd.f32 %v314_v35, %v313_v8 }
  0x53   :  { %v441_v36 = vpop.eup %440  ;;  %v331_v55 = vmul.f32 0.6931472, %v439_v5  ;;  %452 = vlog2.f32 %v223_v56  ;;  %vm364_vm0 = vcmask 1041409   ;;  %v322_v41 = vadd.f32 %v321_v32, %v320_v0 }
  0x54   :  { %v443_v38 = vpop.eup %442  ;;  %v333_v28 = vmul.f32 0.6931472, %v441_v36  ;;  %vm366_vm1 = vcmask 1042434   ;;  %v329_v44 = vadd.f32 %v328_v9, %v327_v1  ;;  %vm368_vm2 = vcmask 1043459  }
  0x55   :  { %v445_v17 = vpop.eup %444  ;;  %v335_v14 = vmul.f32 0.6931472, %v443_v38  ;;  %v346_v39 = vsub.f32 %v331_v55, %v280_v29  ;;  %vm370_vm3 = vcmask 1044484   ;;  %vm372_vm4 = vcmask 1045509  }
  0x56   :  { %v447_v40 = vpop.eup %446  ;;  %v337_v18 = vmul.f32 0.6931472, %v445_v17  ;;  %v347_v42 = vsub.f32 %v333_v28, %v287_v31  ;;  %vm374_vm5 = vcmask 1046534   ;;  %vm376_vm6 = vcmask 1047559  }
  0x57   :  { %v449_v19 = vpop.eup %448  ;;  %v339_v45 = vmul.f32 0.6931472, %v447_v40  ;;  %v348_v46 = vsub.f32 %v335_v14, %v294_v33  ;;  %vm354_vm7 = vcmp.ne.s32.totalorder %v667_v43, 255 }
  0x58   :  { %v451_v24 = vpop.eup %450  ;;  %v341_v47 = vmul.f32 0.6931472, %v449_v19  ;;  %v349_v50 = vsub.f32 %v337_v18, %v301_v12  ;;  %v365_v48 = vsel %vm364_vm0, %v347_v42, %v346_v39 }
  0x59   :  { %v453_v52 = vpop.eup %452  ;;  %v343_v57 = vmul.f32 0.6931472, %v451_v24  ;;  %v350_v59 = vsub.f32 %v339_v45, %v308_v13  ;;  %v367_v61 = vsel %vm366_vm1, %v348_v46, %v365_v48 }
  0x5a   :  { %v345_v62 = vmul.f32 0.6931472, %v453_v52  ;;  %v351_v49 = vsub.f32 %v341_v47, %v315_v37  ;;  %v369_v58 = vsel %vm368_vm2, %v349_v50, %v367_v61 }
  0x5b   :  { %v352_v63 = vsub.f32 %v343_v57, %v322_v41  ;;  %v371_v6 = vsel %vm370_vm3, %v350_v59, %v369_v58 }
  0x5c   :  { %v353_v10 = vsub.f32 %v345_v62, %v329_v44  ;;  %v373_v51 = vsel %vm372_vm4, %v351_v49, %v371_v6 }
  0x5d   :  { %v375_v60 = vsel %vm374_vm5, %v352_v63, %v373_v51 }
  0x5e   :  { %v377_v21 = vsel %vm376_vm6, %v353_v10, %v375_v60 }
  0x5f   :  { %v379_v11 = vsel %vm354_vm7, %v377_v21, 0.0 }
  0x60   :  { %381 = vst [vmem:[#allocation7] sm:$0xff] %v379_v11 }
  0x61   :  { %392 = dma.vmem_to_hbm [thread:$0]  %s388_s1, 128, %s390_s23, [#allocation4]  }
  0x62   :  { %530 = dma.done.wait [#allocation4], 128  }
  0x63   :  { %531 = vsyncadd [#allocation4], 4294967168 }
  0x64   :  { %397 = vsyncpa [#allocation3], 1 }
  0x65   :  { %398 = vsyncpa [#allocation6], 1 }
  0x66   :  { %399 = vsyncpa [#allocation4], 1 }

</bundles_post_ra>
